<compile_context>
chip_gen: v6e
topology: v6e:2x2x1
jax: 0.10.0
libtpu: 0.0.40
codegen_flags: <defaults>
</compile_context>

<pallas_src>
import jax
import jax.numpy as jnp
from jax.experimental import pallas as pl
from jax.experimental.pallas import tpu as pltpu


def _copy_kernel(x_ref, o_ref):
    # Straight VMEM tile copy (lane-dense, unmasked wide stores).
    o_ref[...] = x_ref[...]


# Native sublane multiple per element size (rows per packed vreg tile).
# TODO(synk): 8-byte dtypes (f64/complex) are not native in TPU vregs; guard/cast
# upstream if such inputs are ever possible.
_SUBLANE_BY_ITEMSIZE = {1: 32, 2: 16, 4: 8, 8: 8}

_TARGET_TILE_BYTES = 4 * 1024 * 1024   # ~4 MiB tiles: 4x double-buffered = 16 MiB
_VMEM_LIMIT_BYTES = 40 << 20           # explicit scoped-VMEM limit -> legal on
                                       # v5e (128 MiB phys), v6e (128), v7x (64)


def identity_pallas(x: jax.Array) -> jax.Array:
    """nn.Identity forward: y = x.

    Pure metadata — no pallas_call, no HBM round trip, no launch overhead.
    """
    return x


def _tiled_copy_2d(x2d: jax.Array) -> jax.Array:
    """Streaming copy of a (rows, lanes) array, lanes a multiple of 128."""
    rows, lanes = x2d.shape
    itemsize = x2d.dtype.itemsize
    sub = _SUBLANE_BY_ITEMSIZE.get(itemsize, 8)
    n = rows * lanes
    cost = pl.CostEstimate(flops=0, transcendentals=0,
                           bytes_accessed=2 * n * itemsize)

    # ~4 MiB sublane-aligned tiles.
    tm = max(sub, (_TARGET_TILE_BYTES // (lanes * itemsize)) // sub * sub)
    if tm >= rows:
        if rows > sub:
            # Mid-size array: force >= 2 grid steps so the parallel axis can
            # shard across v7x's 2 TensorCores (half-size tiles beat grid=(1,)).
            tm = ((pl.cdiv(rows, 2) + sub - 1) // sub) * sub
        else:
            tm = rows  # block == full extent: always legal, single step.
    grid = (pl.cdiv(rows, tm),)

    return pl.pallas_call(
        _copy_kernel,
        out_shape=jax.ShapeDtypeStruct((rows, lanes), x2d.dtype),
        grid_spec=pltpu.PrefetchScalarGridSpec(
            num_scalar_prefetch=0,
            grid=grid,
            in_specs=[pl.BlockSpec((tm, lanes), lambda i: (i, 0))],
            out_specs=pl.BlockSpec((tm, lanes), lambda i: (i, 0)),
        ),
        compiler_params=pltpu.CompilerParams(
            dimension_semantics=("parallel",),      # shard steps across v7x TCs
            vmem_limit_bytes=_VMEM_LIMIT_BYTES,     # room for 4 MiB double-buffers
        ),
        # NOTE: only truly in-place when the caller donates x
        # (jax.jit(..., donate_argnums=...)); otherwise XLA copies defensively.
        input_output_aliases={0: 0},
        cost_estimate=cost,
    )(x2d)


def identity_pallas_copy(x: jax.Array) -> jax.Array:
    """Identity forward that materializes a fresh buffer via a Pallas copy kernel.

    Use only when a new buffer is explicitly required; `identity_pallas` is the
    zero-cost path for the actual nn.Identity semantics.
    """
    if x.size == 0:
        return x

    n = int(x.size)
    x1d = jnp.reshape(x, (-1,))

    # Widest lane-dense layout that needs no padding.
    lanes = None
    for cand in (1024, 512, 256, 128):
        if n % cand == 0:
            lanes = cand
            break

    if lanes is not None:
        out2d = _tiled_copy_2d(jnp.reshape(x1d, (n // lanes, lanes)))
        return jnp.reshape(out2d, x.shape)

    # Odd element count: tile the largest 128-divisible prefix through the kernel;
    # the (<128-element) tail is handled by XLA. No whole-array-in-VMEM size cliff.
    prefix = (n // 128) * 128
    if prefix == 0:
        # Fewer than 128 elements: launch overhead dominates; identity anyway.
        return x
    head = _tiled_copy_2d(jnp.reshape(x1d[:prefix], (prefix // 128, 128)))
    tail = x1d[prefix:]
    out1d = jnp.concatenate([jnp.reshape(head, (-1,)), tail])
    return jnp.reshape(out1d, x.shape)


if __name__ == "__main__":
    key = jax.random.PRNGKey(0)
    # Small NCHW input consistent with the model's conv-style usage.
    x = jax.random.normal(key, (2, 4, 16, 16), dtype=jnp.float32)

    # Default Identity forward: zero-cost metadata path (no kernel, per feedback).
    y = jax.block_until_ready(identity_pallas(x))
    assert y.shape == x.shape and y.dtype == x.dtype
    assert bool(jnp.all(y == x))

    # Explicit materializing variant: runs the Pallas copy kernel once on TPU.
    y_copy = jax.block_until_ready(identity_pallas_copy(x))
    assert y_copy.shape == x.shape and y_copy.dtype == x.dtype
    assert bool(jnp.all(y_copy == x))

    # Odd-element-count path (fixed size-cliff fallback): prefix kernel + XLA tail.
    x_odd = jax.random.normal(key, (257,), dtype=jnp.float32)
    y_odd = jax.block_until_ready(identity_pallas_copy(x_odd))
    assert y_odd.shape == x_odd.shape and bool(jnp.all(y_odd == x_odd))

    print("KERNEL_OK")
</pallas_src>

<mosaic_0001>
module attributes {stable_mosaic.version = 11 : i64} {
  func.func @_copy_kernel(%arg0: i32, %arg1: memref<2x1024xf32, #tpu.memory_space<vmem>>, %arg2: memref<2x1024xf32, #tpu.memory_space<vmem>>) attributes {dimension_semantics = [#tpu.dimension_semantics<parallel>], iteration_bounds = array<i64: 1>, scalar_prefetch = 0 : i64, scratch_operands = 0 : i64, tpu.core_type = #tpu.core_type<tc>, window_params = [{transform_indices = @transform_0, window_bounds = array<i64: 2, 1024>}, {transform_indices = @transform_1, window_bounds = array<i64: 2, 1024>}]} {
    %c0 = arith.constant 0 : index
    %c0_0 = arith.constant 0 : index
    %0 = vector.load %arg1[%c0, %c0_0] : memref<2x1024xf32, #tpu.memory_space<vmem>>, vector<2x1024xf32>
    %c0_1 = arith.constant 0 : index
    %c0_2 = arith.constant 0 : index
    %1 = vector.load %arg2[%c0_1, %c0_2] : memref<2x1024xf32, #tpu.memory_space<vmem>>, vector<2x1024xf32>
    tpu.vector_store %arg2[%c0_1, %c0_2], %0 {strides = array<i32>} : memref<2x1024xf32, #tpu.memory_space<vmem>>, vector<2x1024xf32>,
    return
  }
  func.func @transform_0(%arg0: i32) -> (i32, i32) {
    %c0_i32 = arith.constant 0 : i32
    %c0_i32_0 = arith.constant 0 : i32
    return %arg0, %c0_i32 : i32, i32
  }
  func.func @transform_1(%arg0: i32) -> (i32, i32) {
    %c0_i32 = arith.constant 0 : i32
    %c0_i32_0 = arith.constant 0 : i32
    return %arg0, %c0_i32 : i32, i32
  }
}

</mosaic_0001>

<bundles_post_ra>
// kernel: tpu_custom_call.1
= control target key start
LH: loop header
LB: loop body
LE: loop exit
PB: predicated region body
PF: predicated region fallthrough
CT: control target
= control target key end

     0   :  { %6 = vsyncpa [#allocation3], 0  ;;  %s104_s0 = inlined_call_operand.hbm [shape: f32[2,1024], index: 0, kind: input, shape index: {}, may-alias: {0,1}]   ;;  %s105_s1 = inlined_call_operand.hbm [shape: f32[2,1024], index: 1, kind: output, shape index: {}, may-alias: {0,1}]  }
   0x1   :  { %7 = vsyncpa [#allocation4], 0  ;;  %s86_s6 = smov [#allocation2]  }
   0x2   :  { %s14_s7 = sshll.u32 %s86_s6, 4  ;;  %s15_s7 = int_to_ptr.vmem [resolvable:$true] %s14_s7 }
   0x3   :  { %s50_s8 = scalar_lea.vmem %s15_s7, 256  ;;  %p55_p1 = scmp.lt.s32.totalorder %s15_s7, %s15_s7 }
   0x4   :  { %p51_p0 = scmp.ne.s32.totalorder %s15_s7, %s50_s8  ;;  %p56_p2 = scmp.lt.s32.totalorder %s50_s8, %s50_s8 }
   0x6   :  { %p57_p3 = por %p56_p2, %p55_p1 }
   0x8   :  { %p58_p4 = pnand %p57_p3, %p51_p0 }
   0xa   :  { %61 = shalt.err (!%p58_p4)
}
   0xb   :  { %17 = dma.hbm_to_vmem [thread:$0]  %s104_s0, 256, %s15_s7, [#allocation3]  }
   0xc   :  { %82 = dma.done.wait [#allocation3], 256  }
   0xd   :  { %83 = vsyncadd [#allocation3], 4294967040  ;;  %s87_s11 = smov [#allocation5]   ;;  %v21_v0 = vld [vmem:[#allocation2] sm:$0xff]  ;;  %v22_v1 = vld [vmem:[#allocation2 + $0x8] sm:$0xff] }
   0xe   :  { %s31_s12 = sshll.u32 %s87_s11, 4  ;;  %23 = vst [vmem:[#allocation5] sm:$0xff] %v21_v0  ;;  %24 = vst [vmem:[#allocation5 + $0x8] sm:$0xff] %v22_v1  ;;  %s32_s12 = int_to_ptr.vmem [resolvable:$true] %s31_s12 }
   0xf   :  { %s62_s13 = scalar_lea.vmem %s32_s12, 256  ;;  %p67_p6 = scmp.lt.s32.totalorder %s32_s12, %s32_s12 }
  0x10   :  { %p63_p5 = scmp.ne.s32.totalorder %s32_s12, %s62_s13  ;;  %p68_p7 = scmp.lt.s32.totalorder %s62_s13, %s62_s13 }
  0x12   :  { %p69_p8 = por %p68_p7, %p67_p6 }
  0x14   :  { %p70_p9 = pnand %p69_p8, %p63_p5 }
  0x16   :  { %73 = shalt.err (!%p70_p9)
}
  0x17   :  { %34 = dma.vmem_to_hbm [thread:$0]  %s32_s12, 256, %s105_s1, [#allocation4]  }
  0x18   :  { %84 = dma.done.wait [#allocation4], 256  }
  0x19   :  { %85 = vsyncadd [#allocation4], 4294967040 }
  0x1a   :  { %38 = vsyncpa [#allocation3], 1 }
  0x1b   :  { %39 = vsyncpa [#allocation4], 1 }

</bundles_post_ra>
